<compile_context>
chip_gen: v7x
topology: tpu7x:2x2x1
jax: 0.10.0
libtpu: 0.0.40
codegen_flags: <defaults>
</compile_context>

<pallas_src>
import functools

import jax
import jax.numpy as jnp
from jax.experimental import pallas as pl
from jax.experimental.pallas import tpu as pltpu


def _qnetwork_chunk_kernel(
    x_ref,               # (TC, Bp, D)   time-chunk of inputs
    h0_ref,              # (Bp, H)       initial hidden state (consumed at chunk 0)
    w1_ref, b1_ref,      # (D, H), (1, H)        l1 with normalization folded in
    wg_ref, bg_ref,      # (2H, 4H), (1, 4H)     fused GRU gates: [a|h] -> [rz_sum, gi_n, gh_n]
    wout_ref, bout_ref,  # (H, K*N), (1, K*N)    fused output heads
    q_ref,               # (TC, Bp, K*N) time-chunk of fused Q outputs
    h_out_ref,           # (Bp, H)       final hidden state; resident block doubles as carry
    *, hidden: int, tc: int, total_t: int, guard: bool,
):
    c = pl.program_id(0)
    H = hidden

    @pl.when(c == 0)
    def _():
        h_out_ref[...] = h0_ref[...]

    # Hoist all weight / bias loads out of the unrolled time loop.
    h = h_out_ref[...]
    w1, b1 = w1_ref[...], b1_ref[...]
    wg, bg = wg_ref[...], bg_ref[...]
    wout, bout = wout_ref[...], bout_ref[...]

    for i in range(tc):  # static unroll: tiny trip count, static slice indices
        # ---- l1 + ReLU (normalization pre-folded) ----
        a = jnp.maximum(
            jnp.dot(x_ref[i], w1, preferred_element_type=jnp.float32) + b1, 0.0)

        # ---- fused GRU gates (torch.nn.GRUCell, gate order r, z, n) ----
        g = jnp.dot(jnp.concatenate([a, h], axis=-1), wg,
                    preferred_element_type=jnp.float32) + bg          # (Bp, 4H)
        rz = jax.nn.sigmoid(g[:, :2 * H])                             # r and z together
        r = rz[:, :H]
        z = rz[:, H:]
        n = jnp.tanh(g[:, 2 * H:3 * H] + r * g[:, 3 * H:])
        h_new = (1.0 - z) * n + z * h

        # ---- fused output heads: one MXU matmul + one contiguous store ----
        q_ref[i] = jnp.dot(h_new, wout, preferred_element_type=jnp.float32) + bout

        if guard:  # only emitted when time padding exists: keep h frozen past step T-1
            h = jnp.where(c * tc + i < total_t, h_new, h)
        else:
            h = h_new

    h_out_ref[...] = h


def prepare_params(raw):
    """One-time parameter transform: fold normalization, fuse GRU gates & output heads."""
    inv = 1.0 / (raw["high"] - raw["low"])                  # (1, D)
    w1_f = raw["w1"] * inv.reshape(-1, 1)                   # (D, H) row-scaled
    b1_f = raw["b1"] - (raw["low"] * inv) @ raw["w1"]       # (1, H)

    H = raw["w1"].shape[1]
    wih, whh = raw["wih"], raw["whh"]
    bih, bhh = raw["bih"], raw["bhh"]
    zeros = jnp.zeros((H, H), jnp.float32)
    # Columns of Wg: [ rz-sum (2H) | gi_n (H) | gh_n (H) ]
    wg = jnp.concatenate([
        jnp.concatenate([wih[:, :2 * H], wih[:, 2 * H:], zeros], axis=1),
        jnp.concatenate([whh[:, :2 * H], zeros, whh[:, 2 * H:]], axis=1),
    ], axis=0)                                              # (2H, 4H)
    bg = jnp.concatenate([bih[:, :2 * H] + bhh[:, :2 * H],
                          bih[:, 2 * H:], bhh[:, 2 * H:]], axis=1)  # (1, 4H)

    K, _, N = raw["wout"].shape
    wout_f = jnp.transpose(raw["wout"], (1, 0, 2)).reshape(H, K * N)  # col block k = head k
    bout_f = raw["bout"].reshape(1, K * N)
    return {"w1": w1_f, "b1": b1_f, "wg": wg, "bg": bg,
            "wout_f": wout_f, "bout_f": bout_f, "n_heads": K, "act_n": N}


def qnetwork_forward_seq(x_seq, h0, p, *, time_chunk=16):
    """Run T timesteps in a single pallas_call (weights resident in VMEM).

    Returns q_seq of shape (T, K*B, N) (torch.cat(dim=0) layout per step) and the
    final hidden state (B, H).
    """
    T, B, D = x_seq.shape
    H = p["w1"].shape[1]
    K, N = p["n_heads"], p["act_n"]
    KN = K * N

    tc = max(1, min(time_chunk, T))
    t_pad = pl.cdiv(T, tc) * tc
    b_pad = pl.cdiv(B, 8) * 8          # full sublanes for loads/stores

    x_p = x_seq
    if t_pad != T or b_pad != B:
        x_p = jnp.pad(x_seq, ((0, t_pad - T), (0, b_pad - B), (0, 0)))
    h0_p = h0 if b_pad == B else jnp.pad(h0, ((0, b_pad - B), (0, 0)))

    kernel = functools.partial(_qnetwork_chunk_kernel, hidden=H, tc=tc,
                               total_t=T, guard=(t_pad != T))
    resident = lambda shape: pl.BlockSpec(shape, lambda c: (0,) * len(shape))

    q_fused, h_new = pl.pallas_call(
        kernel,
        out_shape=(
            jax.ShapeDtypeStruct((t_pad, b_pad, KN), jnp.float32),
            jax.ShapeDtypeStruct((b_pad, H), jnp.float32),
        ),
        grid_spec=pltpu.PrefetchScalarGridSpec(
            num_scalar_prefetch=0,
            grid=(t_pad // tc,),
            in_specs=[
                pl.BlockSpec((tc, b_pad, D), lambda c: (c, 0, 0)),  # x chunk streamed
                resident((b_pad, H)),                               # h0
                resident((D, H)), resident((1, H)),                 # w1, b1
                resident((2 * H, 4 * H)), resident((1, 4 * H)),     # wg, bg
                resident((H, KN)), resident((1, KN)),               # wout_f, bout_f
            ],
            out_specs=(
                pl.BlockSpec((tc, b_pad, KN), lambda c: (c, 0, 0)),  # q chunk streamed
                resident((b_pad, H)),                                # final hidden (carry)
            ),
        ),
        compiler_params=pltpu.CompilerParams(
            dimension_semantics=("arbitrary",),  # sequential recurrence over time
        ),
    )(x_p, h0_p, p["w1"], p["b1"], p["wg"], p["bg"], p["wout_f"], p["bout_f"])

    # Drop padding, rebuild torch.cat(dim=0) head layout: (T, B, K*N) -> (T, K*B, N).
    q_seq = (q_fused[:T, :B].reshape(T, B, K, N)
             .transpose(0, 2, 1, 3).reshape(T, K * B, N))
    return q_seq, h_new[:B]


def qnetwork_forward(x, h0, p):
    """Single-step forward matching the original module's forward()."""
    q_seq, h_new = qnetwork_forward_seq(x[None], h0, p)
    return q_seq[0], h_new


# ----------------------- pure-JAX reference (unfused, original math) -----------------------
def reference_forward(x, h0, raw):
    xn = (x - raw["low"]) / (raw["high"] - raw["low"])
    a = jax.nn.relu(xn @ raw["w1"] + raw["b1"])
    gi = a @ raw["wih"] + raw["bih"]
    gh = h0 @ raw["whh"] + raw["bhh"]
    H = h0.shape[-1]
    r = jax.nn.sigmoid(gi[:, :H] + gh[:, :H])
    z = jax.nn.sigmoid(gi[:, H:2 * H] + gh[:, H:2 * H])
    n = jnp.tanh(gi[:, 2 * H:] + r * gh[:, 2 * H:])
    h = (1.0 - z) * n + z * h0
    q = jnp.concatenate(
        [h @ raw["wout"][k] + raw["bout"][k] for k in range(raw["wout"].shape[0])], axis=0)
    return q, h


def reference_rollout(x_seq, h0, raw):
    qs, h = [], h0
    for t in range(x_seq.shape[0]):
        q, h = reference_forward(x_seq[t], h, raw)
        qs.append(q)
    return jnp.stack(qs, axis=0), h


if __name__ == "__main__":
    # Small synthetic problem consistent with the module:
    #   observation_space.shape = (20,), action_space.nvec = [6, 6]  -> action_dim = 12
    #   in_dim = 20 + 12 = 32, hidden = 32, batch = 4 agents, rollout length T = 8
    obs_dim, nvec = 20, (6, 6)
    action_dim = sum(nvec)
    D = obs_dim + action_dim
    H = 32
    B = 4
    T = 8
    K = len(nvec)
    N = nvec[0]  # torch.cat(dim=0) requires equal act_n across heads (true for QMIX agents)

    key = jax.random.PRNGKey(0)
    ks = jax.random.split(key, 10)

    # Deterministic synthetic parameters (shapes match the torch module's __init__).
    # TODO(synk): torch uses orthogonal init for l1; plain scaled normals used here.
    low = jnp.concatenate([-jnp.ones((obs_dim,)), jnp.zeros((action_dim,))]).reshape(1, D).astype(jnp.float32)
    high = jnp.concatenate([jnp.ones((obs_dim,)), jnp.ones((action_dim,))]).reshape(1, D).astype(jnp.float32)
    raw = {
        "low": low,
        "high": high,
        "w1":   0.1 * jax.random.normal(ks[0], (D, H), jnp.float32),
        "b1":   0.01 * jax.random.normal(ks[1], (1, H), jnp.float32),
        "wih":  0.1 * jax.random.normal(ks[2], (H, 3 * H), jnp.float32),
        "bih":  0.01 * jax.random.normal(ks[3], (1, 3 * H), jnp.float32),
        "whh":  0.1 * jax.random.normal(ks[4], (H, 3 * H), jnp.float32),
        "bhh":  0.01 * jax.random.normal(ks[5], (1, 3 * H), jnp.float32),
        "wout": 0.1 * jax.random.normal(ks[6], (K, H, N), jnp.float32),
        "bout": 0.01 * jax.random.normal(ks[7], (K, N), jnp.float32),
    }
    params = prepare_params(raw)

    x_seq = jax.random.normal(ks[8], (T, B, D), jnp.float32)
    h0 = jnp.zeros((B, H), jnp.float32)  # reset_hidden_state()

    # --- single-step forward (original module semantics) ---
    q1, h1 = qnetwork_forward(x_seq[0], h0, params)
    q1, h1 = jax.block_until_ready((q1, h1))
    q1_ref, h1_ref = reference_forward(x_seq[0], h0, raw)
    assert q1.shape == (K * B, N) and h1.shape == (B, H)
    assert jnp.allclose(q1, q1_ref, atol=1e-5), "single-step q mismatch vs reference"
    assert jnp.allclose(h1, h1_ref, atol=1e-5), "single-step hidden mismatch vs reference"

    # --- full rollout in one pallas_call (weights resident, hidden carried in VMEM) ---
    q_seq, h_fin = qnetwork_forward_seq(x_seq, h0, params)
    q_seq, h_fin = jax.block_until_ready((q_seq, h_fin))
    q_seq_ref, h_fin_ref = reference_rollout(x_seq, h0, raw)
    assert q_seq.shape == (T, K * B, N) and h_fin.shape == (B, H)
    assert jnp.allclose(q_seq, q_seq_ref, atol=1e-5), "rollout q mismatch vs reference"
    assert jnp.allclose(h_fin, h_fin_ref, atol=1e-5), "rollout hidden mismatch vs reference"

    # --- rollout with a chunk size that does NOT divide T (exercises the time-pad guard) ---
    q_seq2, h_fin2 = qnetwork_forward_seq(x_seq, h0, params, time_chunk=5)
    q_seq2, h_fin2 = jax.block_until_ready((q_seq2, h_fin2))
    assert jnp.allclose(q_seq2, q_seq_ref, atol=1e-5), "chunked rollout q mismatch"
    assert jnp.allclose(h_fin2, h_fin_ref, atol=1e-5), "chunked rollout hidden mismatch"

    print("KERNEL_OK")
</pallas_src>

<mosaic_0001>
module attributes {stable_mosaic.version = 11 : i64} {
  func.func @_qnetwork_chunk_kernel(%arg0: i32, %arg1: memref<1x8x32xf32, #tpu.memory_space<vmem>>, %arg2: memref<8x32xf32, #tpu.memory_space<vmem>>, %arg3: memref<32x32xf32, #tpu.memory_space<vmem>>, %arg4: memref<1x32xf32, #tpu.memory_space<vmem>>, %arg5: memref<64x128xf32, #tpu.memory_space<vmem>>, %arg6: memref<1x128xf32, #tpu.memory_space<vmem>>, %arg7: memref<32x12xf32, #tpu.memory_space<vmem>>, %arg8: memref<1x12xf32, #tpu.memory_space<vmem>>, %arg9: memref<1x8x12xf32, #tpu.memory_space<vmem>>, %arg10: memref<8x32xf32, #tpu.memory_space<vmem>>) attributes {dimension_semantics = [#tpu.dimension_semantics<arbitrary>], iteration_bounds = array<i64: 1>, scalar_prefetch = 0 : i64, scratch_operands = 0 : i64, tpu.core_type = #tpu.core_type<tc>, window_params = [{transform_indices = @transform_0, window_bounds = array<i64: 1, 8, 32>}, {pipeline_mode = #tpu.pipeline_mode<synchronous>, transform_indices = @transform_1, window_bounds = array<i64: 8, 32>}, {pipeline_mode = #tpu.pipeline_mode<synchronous>, transform_indices = @transform_2, window_bounds = array<i64: 32, 32>}, {pipeline_mode = #tpu.pipeline_mode<synchronous>, transform_indices = @transform_3, window_bounds = array<i64: 1, 32>}, {pipeline_mode = #tpu.pipeline_mode<synchronous>, transform_indices = @transform_4, window_bounds = array<i64: 64, 128>}, {pipeline_mode = #tpu.pipeline_mode<synchronous>, transform_indices = @transform_5, window_bounds = array<i64: 1, 128>}, {pipeline_mode = #tpu.pipeline_mode<synchronous>, transform_indices = @transform_6, window_bounds = array<i64: 32, 12>}, {pipeline_mode = #tpu.pipeline_mode<synchronous>, transform_indices = @transform_7, window_bounds = array<i64: 1, 12>}, {transform_indices = @transform_8, window_bounds = array<i64: 1, 8, 12>}, {pipeline_mode = #tpu.pipeline_mode<synchronous>, transform_indices = @transform_9, window_bounds = array<i64: 8, 32>}]} {
    %c0_i32 = arith.constant 0 : i32
    %0 = arith.cmpi eq, %arg0, %c0_i32 : i32
    %1 = arith.extui %0 : i1 to i32
    %c0_i32_0 = arith.constant 0 : i32
    %2 = arith.cmpi ne, %1, %c0_i32_0 : i32
    scf.if %2 {
      %c0_27 = arith.constant 0 : index
      %c0_28 = arith.constant 0 : index
      %46 = vector.load %arg2[%c0_27, %c0_28] : memref<8x32xf32, #tpu.memory_space<vmem>>, vector<8x32xf32>
      %c0_29 = arith.constant 0 : index
      %c0_30 = arith.constant 0 : index
      %47 = vector.load %arg10[%c0_29, %c0_30] : memref<8x32xf32, #tpu.memory_space<vmem>>, vector<8x32xf32>
      tpu.vector_store %arg10[%c0_29, %c0_30], %46 {strides = array<i32>} : memref<8x32xf32, #tpu.memory_space<vmem>>, vector<8x32xf32>,
    } else {
    }
    %c0 = arith.constant 0 : index
    %c0_1 = arith.constant 0 : index
    %3 = vector.load %arg10[%c0, %c0_1] : memref<8x32xf32, #tpu.memory_space<vmem>>, vector<8x32xf32>
    %c0_2 = arith.constant 0 : index
    %c0_3 = arith.constant 0 : index
    %4 = vector.load %arg3[%c0_2, %c0_3] : memref<32x32xf32, #tpu.memory_space<vmem>>, vector<32x32xf32>
    %c0_4 = arith.constant 0 : index
    %c0_5 = arith.constant 0 : index
    %5 = vector.load %arg4[%c0_4, %c0_5] : memref<1x32xf32, #tpu.memory_space<vmem>>, vector<1x32xf32>
    %c0_6 = arith.constant 0 : index
    %c0_7 = arith.constant 0 : index
    %6 = vector.load %arg5[%c0_6, %c0_7] : memref<64x128xf32, #tpu.memory_space<vmem>>, vector<64x128xf32>
    %c0_8 = arith.constant 0 : index
    %c0_9 = arith.constant 0 : index
    %7 = vector.load %arg6[%c0_8, %c0_9] : memref<1x128xf32, #tpu.memory_space<vmem>>, vector<1x128xf32>
    %c0_10 = arith.constant 0 : index
    %c0_11 = arith.constant 0 : index
    %8 = vector.load %arg7[%c0_10, %c0_11] : memref<32x12xf32, #tpu.memory_space<vmem>>, vector<32x12xf32>
    %c0_12 = arith.constant 0 : index
    %c0_13 = arith.constant 0 : index
    %9 = vector.load %arg8[%c0_12, %c0_13] : memref<1x12xf32, #tpu.memory_space<vmem>>, vector<1x12xf32>
    %c0_14 = arith.constant 0 : index
    %c0_15 = arith.constant 0 : index
    %c0_16 = arith.constant 0 : index
    %10 = vector.load %arg1[%c0_14, %c0_15, %c0_16] : memref<1x8x32xf32, #tpu.memory_space<vmem>>, vector<1x8x32xf32>
    %11 = vector.shape_cast %10 : vector<1x8x32xf32> to vector<8x32xf32>
    %cst = arith.constant dense<0.000000e+00> : vector<8x32xf32>
    %12 = tpu.matmul %11, %4, %cst {dimension_numbers = #tpu.dot_dimension_numbers<[1], [0], [0], [1], [0, 0, 1, 1], [], []>} : vector<8x32xf32>, vector<32x32xf32>, vector<8x32xf32> -> vector<8x32xf32>
    %13 = vector.broadcast %5 : vector<1x32xf32> to vector<8x32xf32>
    %14 = arith.addf %12, %13 : vector<8x32xf32>
    %cst_17 = arith.constant 0.000000e+00 : f32
    %15 = vector.broadcast %cst_17 : f32 to vector<8x32xf32>
    %16 = arith.maximumf %14, %15 : vector<8x32xf32>
    %17 = tpu.concatenate %16, %3 in 1 : vector<8x32xf32>, vector<8x32xf32> -> vector<8x64xf32>
    %cst_18 = arith.constant dense<0.000000e+00> : vector<8x128xf32>
    %18 = tpu.matmul %17, %6, %cst_18 {dimension_numbers = #tpu.dot_dimension_numbers<[1], [0], [0], [1], [0, 0, 1, 1], [], []>} : vector<8x64xf32>, vector<64x128xf32>, vector<8x128xf32> -> vector<8x128xf32>
    %19 = vector.broadcast %7 : vector<1x128xf32> to vector<8x128xf32>
    %20 = arith.addf %18, %19 : vector<8x128xf32>
    %21 = vector.extract_strided_slice %20 {offsets = [0, 0], sizes = [8, 64], strides = [1, 1]} : vector<8x128xf32> to vector<8x64xf32>
    %22 = arith.negf %21 : vector<8x64xf32>
    %23 = math.exp %22 : vector<8x64xf32>
    %cst_19 = arith.constant 1.000000e+00 : f32
    %24 = vector.broadcast %cst_19 : f32 to vector<8x64xf32>
    %25 = arith.addf %24, %23 : vector<8x64xf32>
    %26 = arith.divf %24, %25 : vector<8x64xf32>
    %27 = vector.extract_strided_slice %26 {offsets = [0, 0], sizes = [8, 32], strides = [1, 1]} : vector<8x64xf32> to vector<8x32xf32>
    %28 = vector.extract_strided_slice %26 {offsets = [0, 32], sizes = [8, 32], strides = [1, 1]} : vector<8x64xf32> to vector<8x32xf32>
    %29 = vector.extract_strided_slice %20 {offsets = [0, 64], sizes = [8, 32], strides = [1, 1]} : vector<8x128xf32> to vector<8x32xf32>
    %30 = vector.extract_strided_slice %20 {offsets = [0, 96], sizes = [8, 32], strides = [1, 1]} : vector<8x128xf32> to vector<8x32xf32>
    %31 = arith.mulf %27, %30 : vector<8x32xf32>
    %32 = arith.addf %29, %31 : vector<8x32xf32>
    %33 = math.tanh %32 : vector<8x32xf32>
    %cst_20 = arith.constant 1.000000e+00 : f32
    %34 = vector.broadcast %cst_20 : f32 to vector<8x32xf32>
    %35 = arith.subf %34, %28 : vector<8x32xf32>
    %36 = arith.mulf %35, %33 : vector<8x32xf32>
    %37 = arith.mulf %28, %3 : vector<8x32xf32>
    %38 = arith.addf %36, %37 : vector<8x32xf32>
    %cst_21 = arith.constant dense<0.000000e+00> : vector<8x12xf32>
    %39 = tpu.matmul %38, %8, %cst_21 {dimension_numbers = #tpu.dot_dimension_numbers<[1], [0], [0], [1], [0, 0, 1, 1], [], []>} : vector<8x32xf32>, vector<32x12xf32>, vector<8x12xf32> -> vector<8x12xf32>
    %40 = vector.broadcast %9 : vector<1x12xf32> to vector<8x12xf32>
    %41 = arith.addf %39, %40 : vector<8x12xf32>
    %c0_22 = arith.constant 0 : index
    %c0_23 = arith.constant 0 : index
    %c0_24 = arith.constant 0 : index
    %42 = vector.load %arg9[%c0_22, %c0_23, %c0_24] : memref<1x8x12xf32, #tpu.memory_space<vmem>>, vector<1x8x12xf32>
    %43 = vector.shape_cast %42 : vector<1x8x12xf32> to vector<8x12xf32>
    %44 = vector.shape_cast %41 : vector<8x12xf32> to vector<1x8x12xf32>
    tpu.vector_store %arg9[%c0_22, %c0_23, %c0_24], %44 {strides = array<i32>} : memref<1x8x12xf32, #tpu.memory_space<vmem>>, vector<1x8x12xf32>,
    %c0_25 = arith.constant 0 : index
    %c0_26 = arith.constant 0 : index
    %45 = vector.load %arg10[%c0_25, %c0_26] : memref<8x32xf32, #tpu.memory_space<vmem>>, vector<8x32xf32>
    tpu.vector_store %arg10[%c0_25, %c0_26], %38 {strides = array<i32>} : memref<8x32xf32, #tpu.memory_space<vmem>>, vector<8x32xf32>,
    return
  }
  func.func @transform_0(%arg0: i32) -> (i32, i32, i32) {
    %c0_i32 = arith.constant 0 : i32
    %c0_i32_0 = arith.constant 0 : i32
    %c0_i32_1 = arith.constant 0 : i32
    return %arg0, %c0_i32, %c0_i32_0 : i32, i32, i32
  }
  func.func @transform_1(%arg0: i32) -> (i32, i32) {
    %c0_i32 = arith.constant 0 : i32
    %c0_i32_0 = arith.constant 0 : i32
    %c0_i32_1 = arith.constant 0 : i32
    return %c0_i32, %c0_i32_0 : i32, i32
  }
  func.func @transform_2(%arg0: i32) -> (i32, i32) {
    %c0_i32 = arith.constant 0 : i32
    %c0_i32_0 = arith.constant 0 : i32
    %c0_i32_1 = arith.constant 0 : i32
    return %c0_i32, %c0_i32_0 : i32, i32
  }
  func.func @transform_3(%arg0: i32) -> (i32, i32) {
    %c0_i32 = arith.constant 0 : i32
    %c0_i32_0 = arith.constant 0 : i32
    %c0_i32_1 = arith.constant 0 : i32
    return %c0_i32, %c0_i32_0 : i32, i32
  }
  func.func @transform_4(%arg0: i32) -> (i32, i32) {
    %c0_i32 = arith.constant 0 : i32
    %c0_i32_0 = arith.constant 0 : i32
    %c0_i32_1 = arith.constant 0 : i32
    return %c0_i32, %c0_i32_0 : i32, i32
  }
  func.func @transform_5(%arg0: i32) -> (i32, i32) {
    %c0_i32 = arith.constant 0 : i32
    %c0_i32_0 = arith.constant 0 : i32
    %c0_i32_1 = arith.constant 0 : i32
    return %c0_i32, %c0_i32_0 : i32, i32
  }
  func.func @transform_6(%arg0: i32) -> (i32, i32) {
    %c0_i32 = arith.constant 0 : i32
    %c0_i32_0 = arith.constant 0 : i32
    %c0_i32_1 = arith.constant 0 : i32
    return %c0_i32, %c0_i32_0 : i32, i32
  }
  func.func @transform_7(%arg0: i32) -> (i32, i32) {
    %c0_i32 = arith.constant 0 : i32
    %c0_i32_0 = arith.constant 0 : i32
    %c0_i32_1 = arith.constant 0 : i32
    return %c0_i32, %c0_i32_0 : i32, i32
  }
  func.func @transform_8(%arg0: i32) -> (i32, i32, i32) {
    %c0_i32 = arith.constant 0 : i32
    %c0_i32_0 = arith.constant 0 : i32
    %c0_i32_1 = arith.constant 0 : i32
    return %arg0, %c0_i32, %c0_i32_0 : i32, i32, i32
  }
  func.func @transform_9(%arg0: i32) -> (i32, i32) {
    %c0_i32 = arith.constant 0 : i32
    %c0_i32_0 = arith.constant 0 : i32
    %c0_i32_1 = arith.constant 0 : i32
    return %c0_i32, %c0_i32_0 : i32, i32
  }
}

</mosaic_0001>

<bundles_post_ra>
// kernel: tpu_custom_call.1
= control target key start
LH: loop header
LB: loop body
LE: loop exit
PB: predicated region body
PF: predicated region fallthrough
CT: control target
= control target key end

     0   :  { %15 = vsyncpa [#allocation3], 0  ;;  %s712_s0 = inlined_call_operand.vmem [shape: f32[1,8,32], index: 0, kind: input, shape index: {}]   ;;  %s713_s1 = inlined_call_operand.vmem [shape: f32[8,32], index: 1, kind: input, shape index: {}]   ;;  %s714_s2 = inlined_call_operand.vmem [shape: f32[32,32], index: 2, kind: input, shape index: {}]   ;;  %s715_s3 = inlined_call_operand.vmem [shape: f32[1,32], index: 3, kind: input, shape index: {}]   ;;  %s716_s4 = inlined_call_operand.hbm [shape: f32[64,128], index: 4, kind: input, shape index: {}]   ;;  %s717_s5 = inlined_call_operand.vmem [shape: f32[1,128], index: 5, kind: input, shape index: {}]   ;;  %s718_s6 = inlined_call_operand.vmem [shape: f32[32,12], index: 6, kind: input, shape index: {}]   ;;  %s719_s7 = inlined_call_operand.vmem [shape: f32[1,12], index: 7, kind: input, shape index: {}]   ;;  %s720_s8 = inlined_call_operand.hbm [shape: f32[1,8,12], index: 8, kind: output, shape index: {0}]   ;;  %s721_s9 = inlined_call_operand.hbm [shape: f32[8,32], index: 9, kind: output, shape index: {1}]  }
   0x1   :  { %16 = vsyncpa [#allocation4], 0 }
   0x2   :  { %17 = vsyncpa [#allocation7], 0  ;;  %s560_s30 = smov [#allocation2]   ;;  %s488_s13 = scalar_lea.hbm %s716_s4, 1024 }
   0x3   :  { %s31_s10 = sshll.u32 %s560_s30, 4  ;;  %p489_p0 = scmp.ne.s32.totalorder %s716_s4, %s488_s13  ;;  %s32_s10 = int_to_ptr.vmem [resolvable:$true] %s31_s10 }
   0x4   :  { %p492_p1 = scmp.lt.u32.totalorder %s488_s13, %s716_s4 }
   0x6   :  { %p494_p2 = pnand %p492_p1, %p489_p0 }
   0x8   :  { %497 = shalt.err (!%p494_p2)
}
   0x9   :  { %s498_s18 = scalar_lea.vmem %s32_s10, 1024  ;;  %p503_p4 = scmp.lt.s32.totalorder %s32_s10, %s32_s10 }
   0xa   :  { %p499_p3 = scmp.ne.s32.totalorder %s32_s10, %s498_s18  ;;  %p504_p5 = scmp.lt.s32.totalorder %s498_s18, %s498_s18 }
   0xc   :  { %p505_p6 = por %p504_p5, %p503_p4 }
   0xe   :  { %p506_p7 = pnand %p505_p6, %p499_p3 }
  0x10   :  { %509 = shalt.err (!%p506_p7)
}
  0x11   :  { %s561_s19 = smov 128   ;;  %s562_s20 = smov 8  }
  0x12   :  { %37 = dma.hbm_to_vmem [thread:$0]  %s716_s4, 1024, %s32_s10, [#allocation3], %s561_s19, %s561_s19, %s562_s20  }
  0x13   :  { %554 = dma.done.wait [#allocation3], 1024  }
  0x14   :  { %555 = vsyncadd [#allocation3], 4294966272  ;;  %v563_v0 = vmov 0.0|0.0   ;;  %vm564_vm0 = vmmov 0   ;;  %v565_v1 = vmov 0.0   ;;  %v55_v2 = vld [vmem:[%s714_s2] sm:$0xff] }
  0x15   :  { %447 = vmatprep.subr.bf16.mxu0 %v563_v0  ;;  %414 = vmatprep.mubr.msk.f32.mxu0 %vm564_vm0, %v565_v1  ;;  %v56_v3 = vld [vmem:[%s714_s2 + $0x8] sm:$0xff]  ;;  %v57_v4 = vld [vmem:[%s714_s2 + $0x10] sm:$0xff]  ;;  %v58_v6 = vld [vmem:[%s714_s2 + $0x18] sm:$0xff]  ;;  %vm52_vm1 = vcmask 261120   ;;  %s566_s11 = smov 32   ;;  %vm167_vm2 = vcmask 523264  }
  0x16   :  { %453 = vmatprep.subr.bf16.mxu1 %v563_v0  ;;  %433 = vmatprep.mubr.msk.f32.mxu1 %vm564_vm0, %v565_v1  ;;  %v448_v5 = vpack.c.bf16 %v56_v3, %v55_v2  ;;  %v51_v7 = vld [vmem:[%s713_s1] sm:$0xff]  ;;  %v61_v9 = vld [vmem:[#allocation2 + $0x8] sm:$0xff]  ;;  %v62_v10 = vld [vmem:[#allocation2 + $0x10] sm:$0xff]  ;;  %v451_v11 = vpack.c.bf16 %v58_v6, %v57_v4  ;;  %s568_s22 = smov 96  }
  0x17   :  { %53 = vst.msk [vmem:[#allocation6] sm:$0xff] %vm52_vm1, %v51_v7  ;;  %v60_v8 = vld [vmem:[#allocation2] sm:$0xff]  ;;  %v63_v13 = vld [vmem:[#allocation2 + $0x18] sm:$0xff]  ;;  %v65_v16 = vld [vmem:[#allocation2 + $0x28] sm:$0xff] }
  0x18   :  { %449 = vmatpush3.bf16.msra.mxu0 %v448_v5  ;;  %v454_v12 = vpack.c.bf16 %v61_v9, %v60_v8  ;;  %v457_v14 = vpack.c.bf16 %v63_v13, %v62_v10  ;;  %v64_v15 = vld [vmem:[#allocation2 + $0x20] sm:$0xff]  ;;  %v66_v20 = vld [vmem:[#allocation2 + $0x30] sm:$0xff]  ;;  %v67_v21 = vld [vmem:[#allocation2 + $0x38] sm:$0xff] }
  0x19   :  { %450 = vmatprep.subr.bf16.mxu0 %v563_v0  ;;  %v74_v17 = vld [vmem:[%s712_s0] sm:$0xff]  ;;  %v460_v19 = vpack.c.bf16 %v65_v16, %v64_v15  ;;  %v463_v22 = vpack.c.bf16 %v67_v21, %v66_v20  ;;  %v70_v43 = vld [vmem:[%s718_s6 + $0x8] sm:$0xff]  ;;  %v71_v44 = vld [vmem:[%s718_s6 + $0x10] sm:$0xff] }
  0x1a   :  { %455 = vmatpush3.bf16.msra.mxu1 %v454_v12  ;;  %v380_v23 = vld [vmem:[%s715_s3] ss:$0 sm:$0xff]  ;;  %s567_s3 = smov 64   ;;  %v72_v46 = vld [vmem:[%s718_s6 + $0x18] sm:$0xff] }
  0x1b   :  { %456 = vmatprep.subr.bf16.mxu1 %v563_v0  ;;  %v382_v30 = vld [vmem:[%s717_s5] ss:$0 sm:$0xff]  ;;  %v469_v47 = vpack.c.bf16 %v72_v46, %v71_v44 }
  0x1c   :  { %452 = vmatpush3.bf16.msra.mxu0 %v451_v11  ;;  %v69_v42 = vld [vmem:[%s718_s6] sm:$0xff]  ;;  %s569_s6 = smov [#allocation6]  }
  0x1d   :  { %465 = vmatprep.subr.bf16.mxu0 %v563_v0  ;;  %v466_v45 = vpack.c.bf16 %v70_v43, %v69_v42  ;;  %s367_s23 = sshll.u32 %s569_s6, 4  ;;  %s368_s23 = int_to_ptr.vmem [resolvable:$true] %s367_s23 }
  0x1e   :  { %v54_v18 = vld [vmem:[#allocation6] sm:$0xff]  ;;  %458 = vmatpush3.bf16.msra.mxu1 %v457_v14  ;;  %s510_s24 = scalar_lea.vmem %s368_s23, 128  ;;  %p515_p9 = scmp.lt.s32.totalorder %s368_s23, %s368_s23 }
  0x1f   :  { %415 = vmatmul.mubr.msk.f32.vlgmr.msra.gmra.mrb[0].mxu0 %vm52_vm1, %v74_v17  ;;  %157 = vrot.lane.b32.xlu0 %v54_v18, %s566_s11  ;;  %p511_p8 = scmp.ne.s32.totalorder %s368_s23, %s510_s24  ;;  %p516_p10 = scmp.lt.s32.totalorder %s510_s24, %s510_s24 }
  0x20   :  { %459 = vmatprep.subr.bf16.mxu1 %v563_v0  ;;  %444 = vmatprep.mubr.msk.f32.mxu0 %vm564_vm0, %v565_v1 }
  0x21   :  { %467 = vmatpush3.bf16.msra.mxu0 %v466_v45  ;;  %p517_p11 = por %p516_p10, %p515_p9 }
  0x22   :  { %461 = vmatpush3.bf16.msra.mxu1 %v460_v19  ;;  %468 = vmatprep.subr.bf16.mxu0 %v563_v0 }
  0x23   :  { %462 = vmatprep.subr.bf16.mxu1 %v563_v0  ;;  %p518_p12 = pnand %p517_p11, %p511_p8 }
  0x25   :  { %470 = vmatpush3.bf16.msra.mxu0 %v469_v47 }
  0x26   :  { %464 = vmatpush3.bf16.msra.mxu1 %v463_v22 }
  0x91   :  { %v158_v27 = vpop.permute.xlu0 %157 }
  0xf2   :  { %v151_v24 = vpop.f32.mrb[0].mxu0 }
  0xf3   :  { %v152_v25 = vadd.f32 %v380_v23, %v151_v24  ;;  %v416_v26 = vpop.f32.mrb[1].mxu0 }
  0xf5   :  { %v155_v28 = vmax.f32 %v152_v25, 0.0 }
  0xf7   :  { %v160_v29 = vsel %vm52_vm1, %v155_v28, %v158_v27 }
  0xf8   :  { %434 = vmatmul.mubr.msk.f32.vlgmr.msra.gmra.mrb[0].mxu1 %vm167_vm2, %v160_v29 }
 0x1cb   :  { %v237_v31 = vpop.f32.mrb[0].mxu1 }
 0x1cc   :  { %v238_v32 = vadd.f32 %v382_v30, %v237_v31  ;;  %v435_v33 = vpop.f32.mrb[1].mxu1 }
 0x1ce   :  { %248 = vrot.lane.b32.xlu0 %v238_v32, %s566_s11  ;;  %v384_v34 = vmul.f32 -1.442695, %v238_v32 }
 0x1d0   :  { %482 = vpow2.f32 %v384_v34 }
 0x1da   :  { %v483_v35 = vpop.eup %482 }
 0x1db   :  { %v244_v36 = vadd.f32 1.0, %v483_v35 }
 0x1dd   :  { %484 = vrcp.f32 %v244_v36 }
 0x1e7   :  { %v485_v37 = vpop.eup %484 }
 0x1e8   :  { %v258_v49 = vsub.f32 1.0, %v485_v37  ;;  %v264_v51 = vmul.f32 %v485_v37, %v158_v27 }
 0x240   :  { %v249_v38 = vpop.permute.xlu0 %248 }
 0x241   :  { %v251_v39 = vmul.f32 %v485_v37, %v249_v38 }
 0x243   :  { %253 = vrot.lane.b32.xlu1 %v251_v39, %s567_s3 }
 0x2b5   :  { %v254_v40 = vpop.permute.xlu1 %253 }
 0x2b6   :  { %v256_v41 = vadd.f32 %v254_v40, %v238_v32 }
 0x2b8   :  { %486 = vtanh.f32 %v256_v41 }
 0x2c2   :  { %v487_v48 = vpop.eup %486 }
 0x2c3   :  { %260 = vrot.lane.b32.xlu1 %v487_v48, %s568_s22 }
 0x335   :  { %v261_v50 = vpop.permute.xlu1 %260 }
 0x336   :  { %v263_v52 = vmul.f32 %v261_v50, %v258_v49 }
 0x338   :  { %v265_v53 = vadd.f32 %v264_v51, %v263_v52 }
 0x33a   :  { %273 = vrot.lane.b32.xlu0 %v265_v53, %s568_s22 }
 0x3ac   :  { %v274_v54 = vpop.permute.xlu0 %273 }
 0x3ad   :  { %350 = vst.msk [vmem:[#allocation6] sm:$0xff] %vm52_vm1, %v274_v54  ;;  %445 = vmatmul.mubr.msk.f32.vlgmr.msra.gmra.mrb[2].mxu0 %vm52_vm1, %v274_v54 }
 0x3ae   :  { %521 = shalt.err (!%p518_p12)
}
 0x3af   :  { %s522_s4 = scalar_lea.hbm %s721_s9, 128 }
 0x3b0   :  { %p523_p13 = scmp.ne.s32.totalorder %s721_s9, %s522_s4  ;;  %p526_p0 = scmp.lt.u32.totalorder %s522_s4, %s721_s9 }
 0x3b2   :  { %p528_p1 = pnand %p526_p0, %p523_p13 }
 0x3b4   :  { %531 = shalt.err (!%p528_p1)
}
 0x3b5   :  { %370 = dma.vmem_to_hbm [thread:$0]  %s368_s23, 128, %s721_s9, [#allocation7]   ;;  %v385_v55 = vld [vmem:[%s719_s7] ss:$0 sm:$0xff]  ;;  %vm347_vm3 = vcmask 97280  }
 0x3b6   :  { %s570_s0 = smov [#allocation5]  }
 0x3b7   :  { %s357_s12 = sshll.u32 %s570_s0, 4  ;;  %s358_s12 = int_to_ptr.vmem [resolvable:$true] %s357_s12 }
 0x3b8   :  { %s532_s13 = scalar_lea.vmem %s358_s12, 128  ;;  %p537_p3 = scmp.lt.s32.totalorder %s358_s12, %s358_s12 }
 0x3b9   :  { %p533_p2 = scmp.ne.s32.totalorder %s358_s12, %s532_s13  ;;  %p538_p4 = scmp.lt.s32.totalorder %s532_s13, %s532_s13 }
 0x3bb   :  { %p539_p5 = por %p538_p4, %p537_p3 }
 0x3bd   :  { %p540_p6 = pnand %p539_p5, %p533_p2 }
 0x480   :  { %v343_v56 = vpop.f32.mrb[2].mxu0 }
 0x481   :  { %v344_v57 = vadd.f32 %v385_v55, %v343_v56  ;;  %v446_v58 = vpop.f32.mrb[3].mxu0 }
 0x483   :  { %348 = vst.msk [vmem:[#allocation5] sm:$0xff] %vm347_vm3, %v344_v57 }
 0x484   :  { %543 = shalt.err (!%p540_p6)
}
 0x485   :  { %s544_s3 = scalar_lea.hbm %s720_s8, 128 }
 0x486   :  { %p545_p7 = scmp.ne.s32.totalorder %s720_s8, %s544_s3  ;;  %p548_p8 = scmp.lt.u32.totalorder %s544_s3, %s720_s8 }
 0x488   :  { %p550_p9 = pnand %p548_p8, %p545_p7 }
 0x48a   :  { %553 = shalt.err (!%p550_p9)
}
 0x48b   :  { %360 = dma.vmem_to_hbm [thread:$0]  %s358_s12, 128, %s720_s8, [#allocation4]  }
 0x48c   :  { %556 = dma.done.wait [#allocation4], 128  }
 0x48d   :  { %557 = vsyncadd [#allocation4], 4294967168 }
 0x48e   :  { %558 = dma.done.wait [#allocation7], 128  }
 0x48f   :  { %559 = vsyncadd [#allocation7], 4294967168 }
 0x490   :  { %377 = vsyncpa [#allocation3], 1 }
 0x491   :  { %378 = vsyncpa [#allocation4], 1 }
 0x492   :  { %379 = vsyncpa [#allocation7], 1 }

</bundles_post_ra>
